<compile_context>
chip_gen: v7x
topology: tpu7x:2x2x1
jax: 0.10.0
libtpu: 0.0.40
codegen_flags: <defaults>
</compile_context>

<pallas_src>
import functools

import jax
import jax.numpy as jnp
from jax.experimental import pallas as pl
from jax.experimental.pallas import tpu as pltpu


# ----------------------------------------------------------------------------
# Fused kernel: backbone (1x1 conv + ReLU) + coord head + pooled pose/roi.
#
#   x_ref     [1, Cin, THW]      (pixels on lanes)
#   w1t_ref   [Chid, Cin]        b1t_ref [Chid, 1]
#   wct_ref   [Cc, Chid]         bct_ref [Cc, 1]
#   wht_ref   [Npose+Nroi, Chid] bht_ref [Npose+Nroi, 1]
#   coord_ref [1, Cc, THW]       (lane-dense store, NCHW-compatible)
#   heads_ref [1, Npose+Nroi, 128]  (written once per batch at last tile)
#   acc_ref   [Chid, 1]          (per-batch pooled-sum accumulator, VMEM)
# ----------------------------------------------------------------------------
def fused_kernel(x_ref, w1t_ref, b1t_ref, wct_ref, bct_ref, wht_ref, bht_ref,
                 coord_ref, heads_ref, acc_ref, *, hw, tile_hw, inv_hw):
    s = pl.program_id(1)                 # spatial tile index (innermost axis)

    @pl.when(s == 0)
    def _():
        acc_ref[...] = jnp.zeros_like(acc_ref)

    x = x_ref[0]                         # [Cin, THW]
    w1t = w1t_ref[...]                   # [Chid, Cin]
    cin = w1t.shape[1]

    # Backbone 1x1 conv: K = Cin is tiny, so use Cin VPU broadcast-MACs
    # (an MXU matmul would use <4% of the systolic depth).
    h = w1t[:, 0:1] * x[0:1, :]
    for k in range(1, cin):
        h = h + w1t[:, k:k + 1] * x[k:k + 1, :]
    h = jnp.maximum(h + b1t_ref[...], 0.0)           # ReLU, [Chid, THW]

    # coord head: lane-dense [Cc, THW] tile, pixels on the lane axis.
    coord_ref[0] = (
        jnp.dot(wct_ref[...], h, preferred_element_type=jnp.float32)
        + bct_ref[...])

    # Fused global-average-pool: masked partial sums (handles tile overhang
    # when HW is not a multiple of the spatial tile).
    pix = s * tile_hw + jax.lax.broadcasted_iota(jnp.int32, h.shape, 1)
    acc_ref[...] += jnp.sum(jnp.where(pix < hw, h, 0.0), axis=1, keepdims=True)

    # Finalize pose/roi heads on the pooled features at the last spatial tile.
    @pl.when(s == pl.num_programs(1) - 1)
    def _():
        pooled = acc_ref[...] * inv_hw                               # [Chid, 1]
        res = (jnp.dot(wht_ref[...], pooled,
                       preferred_element_type=jnp.float32)
               + bht_ref[...])                                       # [10, 1]
        heads_ref[0] = jnp.broadcast_to(
            res, (res.shape[0], heads_ref.shape[-1]))


@jax.jit
def modelwrapper_forward(x_nchw, params):
    """Equivalent of Modelwrapper.forward: returns (coord, pose, roi)."""
    n, c, hgt, wid = x_nchw.shape
    hw = hgt * wid
    x_t = x_nchw.reshape(n, c, hw)       # NCHW -> [N, Cin, HW], pure reshape

    chid = params["w1"].shape[1]
    cc = params["wc"].shape[1]
    n_pose = params["wp"].shape[1]
    n_roi = params["wr"].shape[1]
    n_heads = n_pose + n_roi

    # Tiny one-time weight re-layout: channels on sublanes, pixels on lanes.
    w1t = params["w1"].T                                             # [Chid, Cin]
    b1t = params["b1"].T                                             # [Chid, 1]
    wct = params["wc"].T                                             # [Cc, Chid]
    bct = params["bc"].T                                             # [Cc, 1]
    wht = jnp.concatenate([params["wp"].T, params["wr"].T], axis=0)  # [10, Chid]
    bht = jnp.concatenate([params["bp"], params["br"]], axis=1).T    # [10, 1]

    # One big spatial tile per image when it fits comfortably in VMEM,
    # otherwise 128-aligned tiles with pl.cdiv + in-kernel masking.
    tile_hw = hw if hw <= 4096 else 4096
    grid = (n, pl.cdiv(hw, tile_hw))

    kern = functools.partial(fused_kernel, hw=hw, tile_hw=tile_hw,
                             inv_hw=1.0 / hw)

    coord_t, heads = pl.pallas_call(
        kern,
        out_shape=(
            jax.ShapeDtypeStruct((n, cc, hw), jnp.float32),
            jax.ShapeDtypeStruct((n, n_heads, 128), jnp.float32),
        ),
        grid_spec=pltpu.PrefetchScalarGridSpec(
            num_scalar_prefetch=0,
            grid=grid,
            in_specs=[
                pl.BlockSpec((1, c, tile_hw), lambda b, s: (b, 0, s)),
                pl.BlockSpec((chid, c), lambda b, s: (0, 0)),
                pl.BlockSpec((chid, 1), lambda b, s: (0, 0)),
                pl.BlockSpec((cc, chid), lambda b, s: (0, 0)),
                pl.BlockSpec((cc, 1), lambda b, s: (0, 0)),
                pl.BlockSpec((n_heads, chid), lambda b, s: (0, 0)),
                pl.BlockSpec((n_heads, 1), lambda b, s: (0, 0)),
            ],
            out_specs=[
                pl.BlockSpec((1, cc, tile_hw), lambda b, s: (b, 0, s)),
                pl.BlockSpec((1, n_heads, 128), lambda b, s: (b, 0, 0)),
            ],
            scratch_shapes=[pltpu.VMEM((chid, 1), jnp.float32)],
        ),
        compiler_params=pltpu.CompilerParams(
            dimension_semantics=("parallel", "arbitrary")),
    )(x_t, w1t, b1t, wct, bct, wht, bht)

    coord = coord_t.reshape(n, cc, hgt, wid)        # already NCHW, no transpose
    head_vec = heads[:, :, 0]                       # [N, Npose+Nroi]
    pose = head_vec[:, :n_pose]
    roi = head_vec[:, n_pose:]
    return coord, pose, roi


def init_params(key, cin, chid):
    ks = jax.random.split(key, 8)
    s = 0.1
    return {
        "w1": s * jax.random.normal(ks[0], (cin, chid), jnp.float32),
        "b1": s * jax.random.normal(ks[1], (1, chid), jnp.float32),
        "wc": s * jax.random.normal(ks[2], (chid, 2), jnp.float32),
        "bc": s * jax.random.normal(ks[3], (1, 2), jnp.float32),
        "wp": s * jax.random.normal(ks[4], (chid, 6), jnp.float32),
        "bp": s * jax.random.normal(ks[5], (1, 6), jnp.float32),
        "wr": s * jax.random.normal(ks[6], (chid, 4), jnp.float32),
        "br": s * jax.random.normal(ks[7], (1, 4), jnp.float32),
    }


def reference_forward(x_nchw, p):
    """Pure-JAX reference for correctness checking."""
    n, c, h, w = x_nchw.shape
    xf = jnp.transpose(x_nchw, (0, 2, 3, 1)).reshape(n * h * w, c)
    feat = jnp.maximum(xf @ p["w1"] + p["b1"], 0.0)
    coord = jnp.transpose((feat @ p["wc"] + p["bc"]).reshape(n, h, w, 2),
                          (0, 3, 1, 2))
    pooled = feat.reshape(n, h * w, -1).mean(axis=1)
    pose = pooled @ p["wp"] + p["bp"]
    roi = pooled @ p["wr"] + p["br"]
    return coord, pose, roi


if __name__ == "__main__":
    key = jax.random.PRNGKey(0)
    k_x, k_p = jax.random.split(key)

    N, C, H, W = 2, 4, 16, 16          # NCHW, as in PyTorch
    CHID = 32
    x = jax.random.normal(k_x, (N, C, H, W), jnp.float32)
    params = init_params(k_p, C, CHID)

    coord, pose, roi = modelwrapper_forward(x, params)
    jax.block_until_ready((coord, pose, roi))

    # sanity check against pure-JAX reference
    rc, rp, rr = reference_forward(x, params)
    assert coord.shape == (N, 2, H, W) and pose.shape == (N, 6) and roi.shape == (N, 4)
    assert jnp.allclose(coord, rc, rtol=1e-4, atol=1e-5)
    assert jnp.allclose(pose, rp, rtol=1e-4, atol=1e-5)
    assert jnp.allclose(roi, rr, rtol=1e-4, atol=1e-5)

    print("KERNEL_OK")
</pallas_src>

<mosaic_0001>
module attributes {stable_mosaic.version = 11 : i64} {
  func.func @fused_kernel(%arg0: i32, %arg1: i32, %arg2: memref<1x4x256xf32, #tpu.memory_space<vmem>>, %arg3: memref<32x4xf32, #tpu.memory_space<vmem>>, %arg4: memref<32x1xf32, #tpu.memory_space<vmem>>, %arg5: memref<2x32xf32, #tpu.memory_space<vmem>>, %arg6: memref<2x1xf32, #tpu.memory_space<vmem>>, %arg7: memref<10x32xf32, #tpu.memory_space<vmem>>, %arg8: memref<10x1xf32, #tpu.memory_space<vmem>>, %arg9: memref<1x2x256xf32, #tpu.memory_space<vmem>>, %arg10: memref<1x10x128xf32, #tpu.memory_space<vmem>>, %arg11: memref<32x1xf32, #tpu.memory_space<vmem>>) attributes {dimension_semantics = [#tpu.dimension_semantics<parallel>, #tpu.dimension_semantics<arbitrary>], iteration_bounds = array<i64: 2, 1>, scalar_prefetch = 0 : i64, scratch_operands = 1 : i64, tpu.core_type = #tpu.core_type<tc>, window_params = [{transform_indices = @transform_0, window_bounds = array<i64: 1, 4, 256>}, {pipeline_mode = #tpu.pipeline_mode<synchronous>, transform_indices = @transform_1, window_bounds = array<i64: 32, 4>}, {pipeline_mode = #tpu.pipeline_mode<synchronous>, transform_indices = @transform_2, window_bounds = array<i64: 32, 1>}, {pipeline_mode = #tpu.pipeline_mode<synchronous>, transform_indices = @transform_3, window_bounds = array<i64: 2, 32>}, {pipeline_mode = #tpu.pipeline_mode<synchronous>, transform_indices = @transform_4, window_bounds = array<i64: 2, 1>}, {pipeline_mode = #tpu.pipeline_mode<synchronous>, transform_indices = @transform_5, window_bounds = array<i64: 10, 32>}, {pipeline_mode = #tpu.pipeline_mode<synchronous>, transform_indices = @transform_6, window_bounds = array<i64: 10, 1>}, {transform_indices = @transform_7, window_bounds = array<i64: 1, 2, 256>}, {transform_indices = @transform_8, window_bounds = array<i64: 1, 10, 128>}]} {
    %c0_i32 = arith.constant 0 : i32
    %0 = arith.cmpi eq, %arg1, %c0_i32 : i32
    %1 = arith.extui %0 : i1 to i32
    %c0_i32_0 = arith.constant 0 : i32
    %2 = arith.cmpi ne, %1, %c0_i32_0 : i32
    scf.if %2 {
      %cst_24 = arith.constant 0.000000e+00 : f32
      %58 = vector.broadcast %cst_24 : f32 to vector<32x1xf32>
      %c0_25 = arith.constant 0 : index
      %c0_26 = arith.constant 0 : index
      %59 = vector.load %arg11[%c0_25, %c0_26] : memref<32x1xf32, #tpu.memory_space<vmem>>, vector<32x1xf32>
      tpu.vector_store %arg11[%c0_25, %c0_26], %58 {strides = array<i32>} : memref<32x1xf32, #tpu.memory_space<vmem>>, vector<32x1xf32>,
    } else {
    }
    %c0 = arith.constant 0 : index
    %c0_1 = arith.constant 0 : index
    %c0_2 = arith.constant 0 : index
    %3 = vector.load %arg2[%c0, %c0_1, %c0_2] : memref<1x4x256xf32, #tpu.memory_space<vmem>>, vector<1x4x256xf32>
    %4 = vector.shape_cast %3 : vector<1x4x256xf32> to vector<4x256xf32>
    %c0_3 = arith.constant 0 : index
    %c0_4 = arith.constant 0 : index
    %5 = vector.load %arg3[%c0_3, %c0_4] : memref<32x4xf32, #tpu.memory_space<vmem>>, vector<32x4xf32>
    %6 = vector.extract_strided_slice %5 {offsets = [0, 0], sizes = [32, 1], strides = [1, 1]} : vector<32x4xf32> to vector<32x1xf32>
    %7 = vector.extract_strided_slice %4 {offsets = [0, 0], sizes = [1, 256], strides = [1, 1]} : vector<4x256xf32> to vector<1x256xf32>
    %8 = vector.broadcast %6 : vector<32x1xf32> to vector<32x256xf32>
    %9 = vector.broadcast %7 : vector<1x256xf32> to vector<32x256xf32>
    %10 = arith.mulf %8, %9 : vector<32x256xf32>
    %11 = vector.extract_strided_slice %5 {offsets = [0, 1], sizes = [32, 1], strides = [1, 1]} : vector<32x4xf32> to vector<32x1xf32>
    %12 = vector.extract_strided_slice %4 {offsets = [1, 0], sizes = [1, 256], strides = [1, 1]} : vector<4x256xf32> to vector<1x256xf32>
    %13 = vector.broadcast %11 : vector<32x1xf32> to vector<32x256xf32>
    %14 = vector.broadcast %12 : vector<1x256xf32> to vector<32x256xf32>
    %15 = arith.mulf %13, %14 : vector<32x256xf32>
    %16 = arith.addf %10, %15 : vector<32x256xf32>
    %17 = vector.extract_strided_slice %5 {offsets = [0, 2], sizes = [32, 1], strides = [1, 1]} : vector<32x4xf32> to vector<32x1xf32>
    %18 = vector.extract_strided_slice %4 {offsets = [2, 0], sizes = [1, 256], strides = [1, 1]} : vector<4x256xf32> to vector<1x256xf32>
    %19 = vector.broadcast %17 : vector<32x1xf32> to vector<32x256xf32>
    %20 = vector.broadcast %18 : vector<1x256xf32> to vector<32x256xf32>
    %21 = arith.mulf %19, %20 : vector<32x256xf32>
    %22 = arith.addf %16, %21 : vector<32x256xf32>
    %23 = vector.extract_strided_slice %5 {offsets = [0, 3], sizes = [32, 1], strides = [1, 1]} : vector<32x4xf32> to vector<32x1xf32>
    %24 = vector.extract_strided_slice %4 {offsets = [3, 0], sizes = [1, 256], strides = [1, 1]} : vector<4x256xf32> to vector<1x256xf32>
    %25 = vector.broadcast %23 : vector<32x1xf32> to vector<32x256xf32>
    %26 = vector.broadcast %24 : vector<1x256xf32> to vector<32x256xf32>
    %27 = arith.mulf %25, %26 : vector<32x256xf32>
    %28 = arith.addf %22, %27 : vector<32x256xf32>
    %c0_5 = arith.constant 0 : index
    %c0_6 = arith.constant 0 : index
    %29 = vector.load %arg4[%c0_5, %c0_6] : memref<32x1xf32, #tpu.memory_space<vmem>>, vector<32x1xf32>
    %30 = vector.broadcast %29 : vector<32x1xf32> to vector<32x256xf32>
    %31 = arith.addf %28, %30 : vector<32x256xf32>
    %cst = arith.constant 0.000000e+00 : f32
    %32 = vector.broadcast %cst : f32 to vector<32x256xf32>
    %33 = arith.maximumf %31, %32 : vector<32x256xf32>
    %c0_7 = arith.constant 0 : index
    %c0_8 = arith.constant 0 : index
    %34 = vector.load %arg5[%c0_7, %c0_8] : memref<2x32xf32, #tpu.memory_space<vmem>>, vector<2x32xf32>
    %cst_9 = arith.constant dense<0.000000e+00> : vector<2x256xf32>
    %35 = tpu.matmul %34, %33, %cst_9 {dimension_numbers = #tpu.dot_dimension_numbers<[1], [0], [0], [1], [0, 0, 1, 1], [], []>} : vector<2x32xf32>, vector<32x256xf32>, vector<2x256xf32> -> vector<2x256xf32>
    %c0_10 = arith.constant 0 : index
    %c0_11 = arith.constant 0 : index
    %36 = vector.load %arg6[%c0_10, %c0_11] : memref<2x1xf32, #tpu.memory_space<vmem>>, vector<2x1xf32>
    %37 = vector.broadcast %36 : vector<2x1xf32> to vector<2x256xf32>
    %38 = arith.addf %35, %37 : vector<2x256xf32>
    %c0_12 = arith.constant 0 : index
    %c0_13 = arith.constant 0 : index
    %c0_14 = arith.constant 0 : index
    %39 = vector.load %arg9[%c0_12, %c0_13, %c0_14] : memref<1x2x256xf32, #tpu.memory_space<vmem>>, vector<1x2x256xf32>
    %40 = vector.shape_cast %39 : vector<1x2x256xf32> to vector<2x256xf32>
    %41 = vector.shape_cast %38 : vector<2x256xf32> to vector<1x2x256xf32>
    tpu.vector_store %arg9[%c0_12, %c0_13, %c0_14], %41 {strides = array<i32>} : memref<1x2x256xf32, #tpu.memory_space<vmem>>, vector<1x2x256xf32>,
    %c256_i32 = arith.constant 256 : i32
    %42 = arith.muli %arg1, %c256_i32 : i32
    %43 = tpu.iota {dimensions = array<i32: 1>} : vector<32x256xi32>
    %44 = vector.broadcast %42 : i32 to vector<32x256xi32>
    %45 = arith.addi %44, %43 : vector<32x256xi32>
    %c0_15 = arith.constant 0 : index
    %c0_16 = arith.constant 0 : index
    %46 = vector.load %arg11[%c0_15, %c0_16] : memref<32x1xf32, #tpu.memory_space<vmem>>, vector<32x1xf32>
    %c256_i32_17 = arith.constant 256 : i32
    %47 = vector.broadcast %c256_i32_17 : i32 to vector<32x256xi32>
    %48 = arith.cmpi slt, %45, %47 : vector<32x256xi32>
    %cst_18 = arith.constant 0.000000e+00 : f32
    %49 = vector.broadcast %cst_18 : f32 to vector<32x256xf32>
    %50 = arith.select %48, %33, %49 : vector<32x256xi1>, vector<32x256xf32>
    %cst_19 = arith.constant dense<0.000000e+00> : vector<32xf32>
    %51 = vector.multi_reduction <add>, %50, %cst_19 [1] : vector<32x256xf32> to vector<32xf32>
    %52 = vector.shape_cast %51 : vector<32xf32> to vector<32x1xf32>
    %53 = arith.addf %46, %52 : vector<32x1xf32>
    %c0_20 = arith.constant 0 : index
    %c0_21 = arith.constant 0 : index
    %54 = vector.load %arg11[%c0_20, %c0_21] : memref<32x1xf32, #tpu.memory_space<vmem>>, vector<32x1xf32>
    tpu.vector_store %arg11[%c0_20, %c0_21], %53 {strides = array<i32>} : memref<32x1xf32, #tpu.memory_space<vmem>>, vector<32x1xf32>,
    %c0_i32_22 = arith.constant 0 : i32
    %55 = arith.cmpi eq, %arg1, %c0_i32_22 : i32
    %56 = arith.extui %55 : i1 to i32
    %c0_i32_23 = arith.constant 0 : i32
    %57 = arith.cmpi ne, %56, %c0_i32_23 : i32
    scf.if %57 {
      %c0_24 = arith.constant 0 : index
      %c0_25 = arith.constant 0 : index
      %58 = vector.load %arg11[%c0_24, %c0_25] : memref<32x1xf32, #tpu.memory_space<vmem>>, vector<32x1xf32>
      %cst_26 = arith.constant 3.906250e-03 : f32
      %59 = vector.broadcast %cst_26 : f32 to vector<32x1xf32>
      %60 = arith.mulf %58, %59 : vector<32x1xf32>
      %c0_27 = arith.constant 0 : index
      %c0_28 = arith.constant 0 : index
      %61 = vector.load %arg7[%c0_27, %c0_28] : memref<10x32xf32, #tpu.memory_space<vmem>>, vector<10x32xf32>
      %cst_29 = arith.constant dense<0.000000e+00> : vector<10x1xf32>
      %62 = tpu.matmul %61, %60, %cst_29 {dimension_numbers = #tpu.dot_dimension_numbers<[1], [0], [0], [1], [0, 0, 1, 1], [], []>} : vector<10x32xf32>, vector<32x1xf32>, vector<10x1xf32> -> vector<10x1xf32>
      %c0_30 = arith.constant 0 : index
      %c0_31 = arith.constant 0 : index
      %63 = vector.load %arg8[%c0_30, %c0_31] : memref<10x1xf32, #tpu.memory_space<vmem>>, vector<10x1xf32>
      %64 = arith.addf %62, %63 : vector<10x1xf32>
      %65 = vector.shape_cast %64 : vector<10x1xf32> to vector<10x1xf32>
      %66 = vector.broadcast %65 : vector<10x1xf32> to vector<10x128xf32>
      %c0_32 = arith.constant 0 : index
      %c0_33 = arith.constant 0 : index
      %c0_34 = arith.constant 0 : index
      %67 = vector.load %arg10[%c0_32, %c0_33, %c0_34] : memref<1x10x128xf32, #tpu.memory_space<vmem>>, vector<1x10x128xf32>
      %68 = vector.shape_cast %67 : vector<1x10x128xf32> to vector<10x128xf32>
      %69 = vector.shape_cast %66 : vector<10x128xf32> to vector<1x10x128xf32>
      tpu.vector_store %arg10[%c0_32, %c0_33, %c0_34], %69 {strides = array<i32>} : memref<1x10x128xf32, #tpu.memory_space<vmem>>, vector<1x10x128xf32>,
    } else {
    }
    return
  }
  func.func @transform_0(%arg0: i32, %arg1: i32) -> (i32, i32, i32) {
    %c0_i32 = arith.constant 0 : i32
    %c0_i32_0 = arith.constant 0 : i32
    return %arg0, %c0_i32, %arg1 : i32, i32, i32
  }
  func.func @transform_1(%arg0: i32, %arg1: i32) -> (i32, i32) {
    %c0_i32 = arith.constant 0 : i32
    %c0_i32_0 = arith.constant 0 : i32
    %c0_i32_1 = arith.constant 0 : i32
    return %c0_i32, %c0_i32_0 : i32, i32
  }
  func.func @transform_2(%arg0: i32, %arg1: i32) -> (i32, i32) {
    %c0_i32 = arith.constant 0 : i32
    %c0_i32_0 = arith.constant 0 : i32
    %c0_i32_1 = arith.constant 0 : i32
    return %c0_i32, %c0_i32_0 : i32, i32
  }
  func.func @transform_3(%arg0: i32, %arg1: i32) -> (i32, i32) {
    %c0_i32 = arith.constant 0 : i32
    %c0_i32_0 = arith.constant 0 : i32
    %c0_i32_1 = arith.constant 0 : i32
    return %c0_i32, %c0_i32_0 : i32, i32
  }
  func.func @transform_4(%arg0: i32, %arg1: i32) -> (i32, i32) {
    %c0_i32 = arith.constant 0 : i32
    %c0_i32_0 = arith.constant 0 : i32
    %c0_i32_1 = arith.constant 0 : i32
    return %c0_i32, %c0_i32_0 : i32, i32
  }
  func.func @transform_5(%arg0: i32, %arg1: i32) -> (i32, i32) {
    %c0_i32 = arith.constant 0 : i32
    %c0_i32_0 = arith.constant 0 : i32
    %c0_i32_1 = arith.constant 0 : i32
    return %c0_i32, %c0_i32_0 : i32, i32
  }
  func.func @transform_6(%arg0: i32, %arg1: i32) -> (i32, i32) {
    %c0_i32 = arith.constant 0 : i32
    %c0_i32_0 = arith.constant 0 : i32
    %c0_i32_1 = arith.constant 0 : i32
    return %c0_i32, %c0_i32_0 : i32, i32
  }
  func.func @transform_7(%arg0: i32, %arg1: i32) -> (i32, i32, i32) {
    %c0_i32 = arith.constant 0 : i32
    %c0_i32_0 = arith.constant 0 : i32
    return %arg0, %c0_i32, %arg1 : i32, i32, i32
  }
  func.func @transform_8(%arg0: i32, %arg1: i32) -> (i32, i32, i32) {
    %c0_i32 = arith.constant 0 : i32
    %c0_i32_0 = arith.constant 0 : i32
    %c0_i32_1 = arith.constant 0 : i32
    return %arg0, %c0_i32, %c0_i32_0 : i32, i32, i32
  }
}

</mosaic_0001>

<bundles_post_ra>
// kernel: modelwrapper_forward.1
= control target key start
LH: loop header
LB: loop body
LE: loop exit
PB: predicated region body
PF: predicated region fallthrough
CT: control target
= control target key end

     0   :  { %s1140_s27 = smov 0   ;;  %s1142_s28 = smov 0   ;;  %s1248_s0 = inlined_call_operand.vmem [shape: f32[2,4,256], index: 0, kind: input, shape index: {}]   ;;  %s1249_s1 = inlined_call_operand.vmem [shape: f32[32,4], index: 1, kind: input, shape index: {}]   ;;  %s1250_s2 = inlined_call_operand.vmem [shape: f32[32,1], index: 2, kind: input, shape index: {}]   ;;  %s1251_s3 = inlined_call_operand.vmem [shape: f32[2,32], index: 3, kind: input, shape index: {}]   ;;  %s1252_s4 = inlined_call_operand.vmem [shape: f32[2,1], index: 4, kind: input, shape index: {}]   ;;  %s1253_s5 = inlined_call_operand.vmem [shape: f32[10,32], index: 5, kind: input, shape index: {}]   ;;  %s1254_s6 = inlined_call_operand.vmem [shape: f32[10,1], index: 6, kind: input, shape index: {}]   ;;  %s1255_s7 = inlined_call_operand.vmem [shape: f32[2,2,256], index: 7, kind: output, shape index: {0}]   ;;  %s1256_s8 = inlined_call_operand.vmem [shape: f32[2,10,128], index: 8, kind: output, shape index: {1}]  }
   0x1   :  { %s1144_s29 = smov 0  }
   0x2 LB: > { %s31_s30 = sadd.s32 1, %s1084_s28  ;;  %p977_p0 = scmp.ge.s32.totalorder %s1088_s29, 1  ;;  %s1088_s29 = sphi %s1144_s29, %s19_s29   ;;  %s1084_s28 = sphi %s1142_s28, %s1258_s28   ;;  %s1080_s27 = sphi %s1140_s27, %s1257_s27  }
   0x3   : > { %p33_p1 = scmp.ge.s32.totalorder %s31_s30, 2  ;;  %p286_p2 = scmp.lt.s32.totalorder %s1088_s29, 3 }
   0x5   : > { %s1260_s30 = smov (%p33_p1, %s31_s30), 0  ;;  %p287_p3 = pnand %p977_p0, %p286_p2 }
   0x6   : > { %v368_v0 = vld [vmem:[%s1249_s1] sm:$0xff] (!%p287_p3)  ;;  %v1090_v1 = vmov (!%p287_p3), 3   ;;  %v1091_v2 = vmov (!%p287_p3), 1   ;;  %v369_v3 = vld [vmem:[%s1249_s1 + $0x8] sm:$0xff] (!%p287_p3)  ;;  %v1092_v4 = vmov (!%p287_p3), 2   ;;  %v371_v5 = vld [vmem:[%s1249_s1 + $0x18] sm:$0xff] (!%p287_p3)  ;;  %v393_v13 = vlaneseq (!%p287_p3) }
   0x7   : > { %290 = sbr.rel (%p287_p3) target bundleno = 701 (0x2bd), region = 48  ;;  %1059 = vset.pattern.permute.xlu0 (!%p287_p3), %v1090_v1  ;;  %1055 = vset.pattern.permute.xlu1 (!%p287_p3), %v1091_v2  ;;  %v370_v6 = vld [vmem:[%s1249_s1 + $0x10] sm:$0xff] (!%p287_p3)  ;;  %v1093_v7 = vmov (!%p287_p3), 0   ;;  %v569_v8 = vld [vmem:[%s1250_s2] sm:$0xff] (!%p287_p3)  ;;  %v572_v9 = vld [vmem:[%s1250_s2 + $0x18] sm:$0xff] (!%p287_p3)  ;;  %v1094_v12 = vmov (!%p287_p3), 0.0  }
   0x8   : > { %520 = vperm.xlu0 (!%p287_p3), %1059, %v368_v0   ;;  %420 = vperm.xlu1 (!%p287_p3), %1055, %v368_v0   ;;  %v570_v10 = vld [vmem:[%s1250_s2 + $0x8] sm:$0xff] (!%p287_p3)  ;;  %v571_v11 = vld [vmem:[%s1250_s2 + $0x10] sm:$0xff] (!%p287_p3)  ;;  %vm362_vm0 = vcmask (!%p287_p3), 7168   ;;  %p334_p4 = scmp.lt.s32.totalorder (!%p287_p3), %s1080_s27, 1  ;;  %v394_v14 = vshrl.u32 (!%p287_p3), %v393_v13, 7  ;;  %vm616_vm1 = vcmask (!%p287_p3), 261120  }
   0x9   : > { %684 = vmatprep.mubr.f32.mxu0 (!%p287_p3), %v1094_v12  ;;  %363 = vst.msk [vmem:[#allocation2] sm:$0xff] (!%p287_p3), %vm362_vm0, %v1094_v12  ;;  %364 = vst.msk [vmem:[#allocation2 + $0x8] sm:$0xff] (!%p287_p3), %vm362_vm0, %v1094_v12 }
   0xa   : > { %365 = vst.msk [vmem:[#allocation2 + $0x10] sm:$0xff] (!%p287_p3), %vm362_vm0, %v1094_v12  ;;  %366 = vst.msk [vmem:[#allocation2 + $0x18] sm:$0xff] (!%p287_p3), %vm362_vm0, %v1094_v12  ;;  %v437_v17 = vsub.s32 (!%p287_p3), 1, %v394_v14  ;;  %v441_v18 = vsub.s32 (!%p287_p3), 5, %v394_v14  ;;  %v395_v19 = vsub.s32 (!%p287_p3), 0, %v394_v14  ;;  %v399_v20 = vsub.s32 (!%p287_p3), 4, %v394_v14 }
   0xb   : > { %v487_v24 = vsub.s32 (!%p287_p3), 2, %v394_v14  ;;  %v491_v25 = vsub.s32 (!%p287_p3), 6, %v394_v14  ;;  %v537_v30 = vsub.s32 (!%p287_p3), 3, %v394_v14  ;;  %v541_v31 = vsub.s32 (!%p287_p3), 7, %v394_v14 }
   0xc   : > { %1060 = vset.pattern.permute.xlu0 (!%p287_p3), %v1092_v4  ;;  %424 = vperm.xlu1 (!%p287_p3), %1055, %v369_v3  }
   0xd   : > { %470 = vperm.xlu0 (!%p287_p3), %1060, %v368_v0  }
   0xe   : > { %s1262_s27 = smov (!%p334_p4, %s1080_s27), 1 }
   0xf   : > { %s990_s25 = sshll.u32 %s1262_s27, 3  ;;  %s991_s19 = sshll.u32 %s1262_s27, 2 }
  0x10   : > { %1056 = vset.pattern.permute.xlu1 %v1092_v4  ;;  %s341_s10 = scalar_lea.vmem %s1248_s0, %s990_s25  ;;  %s351_s22 = scalar_lea.vmem %s1255_s7, %s991_s19 }
  0x11   : > { %482 = vperm.xlu0 %1060, %v371_v5   ;;  %474 = vperm.xlu1 %1056, %v369_v3   ;;  %v367_v21 = vld [vmem:[%s341_s10] sm:$0xff]  ;;  %s992_s9 = sshll.u32 %s1262_s27, 4 }
  0x12   : > { %v438_v26 = vrot.slane %v367_v21, %v437_v17  ;;  %v442_v27 = vrot.slane %v367_v21, %v441_v18  ;;  %v396_v28 = vrot.slane %v367_v21, %v395_v19  ;;  %v400_v29 = vrot.slane %v367_v21, %v399_v20  ;;  %s357_s12 = scalar_lea.vmem %s1256_s8, %s992_s9 }
  0x13   : > { %v488_v34 = vrot.slane %v367_v21, %v487_v24  ;;  %v492_v35 = vrot.slane %v367_v21, %v491_v25  ;;  %v538_v40 = vrot.slane %v367_v21, %v537_v30  ;;  %v542_v41 = vrot.slane %v367_v21, %v541_v31 }
  0x14   : > { %v448_v36 = vrot.slane %v438_v26, %v437_v17  ;;  %v452_v37 = vrot.slane %v442_v27, %v437_v17  ;;  %v406_v38 = vrot.slane %v396_v28, %v395_v19  ;;  %v410_v39 = vrot.slane %v400_v29, %v395_v19 }
  0x15   : > { %1063 = vset.pattern.permute.xlu0 %v1093_v7  ;;  %1057 = vset.pattern.permute.xlu1 %v1093_v7  ;;  %v498_v42 = vrot.slane %v488_v34, %v487_v24  ;;  %v502_v43 = vrot.slane %v492_v35, %v487_v24  ;;  %v548_v50 = vrot.slane %v538_v40, %v537_v30 }
  0x16   : > { %374 = vperm.xlu0 %1063, %v368_v0   ;;  %384 = vperm.xlu1 %1057, %v370_v6   ;;  %v552_v51 = vrot.slane %v542_v41, %v537_v30 }
  0x1a   : > { %379 = vperm.xlu0 %1063, %v369_v3   ;;  %1058 = vset.pattern.permute.xlu1 %v1091_v2 }
  0x1b   : > { %428 = vperm.xlu1 %1058, %v370_v6  }
  0x1e   : > { %389 = vperm.xlu0 %1063, %v371_v5  }
  0x1f   : > { %432 = vperm.xlu1 %1058, %v371_v5  }
  0x22   : > { %575 = vperm.xlu0 %1063, %v569_v8  }
  0x23   : > { %1061 = vset.pattern.permute.xlu1 %v1090_v1 }
  0x24   : > { %524 = vperm.xlu1 %1061, %v369_v3  }
  0x26   : > { %590 = vperm.xlu0 %1063, %v572_v9  }
  0x28   : > { %1062 = vset.pattern.permute.xlu1 %v1092_v4 }
  0x29   : > { %478 = vperm.xlu1 %1062, %v370_v6  }
  0x2d   : > { %1064 = vset.pattern.permute.xlu1 %v1090_v1 }
  0x2e   : > { %528 = vperm.xlu1 %1064, %v370_v6  }
  0x32   : > { %532 = vperm.xlu1 %1064, %v371_v5  }
  0x36   : > { %1065 = vset.pattern.permute.xlu1 %v1093_v7 }
  0x37   : > { %580 = vperm.xlu1 %1065, %v570_v10  }
  0x3b   : > { %585 = vperm.xlu1 %1065, %v571_v11  }
  0x87   : > { %v421_v15 = vpop.permute.xlu1 %420  ;;  %v521_v16 = vpop.permute.xlu0 %520 }
  0x88   : > { %v453_v46 = vmul.f32 %v448_v36, %v421_v15  ;;  %v454_v47 = vmul.f32 %v452_v37, %v421_v15  ;;  %v553_v58 = vmul.f32 %v548_v50, %v521_v16  ;;  %v554_v59 = vmul.f32 %v552_v51, %v521_v16 }
  0x8b   : > { %v425_v22 = vpop.permute.xlu1 %424 }
  0x8c   : > { %v471_v23 = vpop.permute.xlu0 %470  ;;  %v455_v16 = vmul.f32 %v448_v36, %v425_v22  ;;  %v456_v17 = vmul.f32 %v452_v37, %v425_v22 }
  0x8d   : > { %v503_v52 = vmul.f32 %v498_v42, %v471_v23  ;;  %v504_v53 = vmul.f32 %v502_v43, %v471_v23 }
  0x90   : > { %v475_v32 = vpop.permute.xlu1 %474  ;;  %v483_v33 = vpop.permute.xlu0 %482 }
  0x91   : > { %v509_v19 = vmul.f32 %v498_v42, %v483_v33  ;;  %v510_v20 = vmul.f32 %v502_v43, %v483_v33  ;;  %v505_v26 = vmul.f32 %v498_v42, %v475_v32  ;;  %v506_v27 = vmul.f32 %v502_v43, %v475_v32 }
  0x95   : > { %v375_v44 = vpop.permute.xlu0 %374  ;;  %v385_v45 = vpop.permute.xlu1 %384 }
  0x96   : > { %v411_v48 = vmul.f32 %v406_v38, %v375_v44  ;;  %v412_v49 = vmul.f32 %v410_v39, %v375_v44  ;;  %v415_v30 = vmul.f32 %v406_v38, %v385_v45  ;;  %v416_v31 = vmul.f32 %v410_v39, %v385_v45 }
  0x98   : > { %v461_v54 = vadd.f32 %v453_v46, %v411_v48  ;;  %v462_v55 = vadd.f32 %v454_v47, %v412_v49 }
  0x99   : > { %v380_v56 = vpop.permute.xlu0 %379 }
  0x9a   : > { %v429_v57 = vpop.permute.xlu1 %428  ;;  %v511_v60 = vadd.f32 %v503_v52, %v461_v54  ;;  %v512_v61 = vadd.f32 %v504_v53, %v462_v55  ;;  %v413_v14 = vmul.f32 %v406_v38, %v380_v56  ;;  %v414_v15 = vmul.f32 %v410_v39, %v380_v56 }
  0x9b   : > { %v457_v28 = vmul.f32 %v448_v36, %v429_v57  ;;  %v458_v29 = vmul.f32 %v452_v37, %v429_v57 }
  0x9c   : > { %v561_v0 = vadd.f32 %v553_v58, %v511_v60  ;;  %v562_v1 = vadd.f32 %v554_v59, %v512_v61  ;;  %v463_v24 = vadd.f32 %v455_v16, %v413_v14  ;;  %v464_v25 = vadd.f32 %v456_v17, %v414_v15  ;;  %v710_v15 = vld [vmem:[#allocation2] sm:$0xff] }
  0x9d   : > { %v390_v62 = vpop.permute.xlu0 %389  ;;  %v465_v52 = vadd.f32 %v457_v28, %v415_v30  ;;  %v466_v53 = vadd.f32 %v458_v29, %v416_v31 }
  0x9e   : > { %v433_v63 = vpop.permute.xlu1 %432  ;;  %v417_v10 = vmul.f32 %v406_v38, %v390_v62  ;;  %v418_v11 = vmul.f32 %v410_v39, %v390_v62  ;;  %v513_v33 = vadd.f32 %v505_v26, %v463_v24  ;;  %v514_v49 = vadd.f32 %v506_v27, %v464_v25  ;;  %v712_v25 = vld [vmem:[#allocation2 + $0x10] sm:$0xff] }
  0x9f   : > { %v459_v12 = vmul.f32 %v448_v36, %v433_v63  ;;  %v460_v13 = vmul.f32 %v452_v37, %v433_v63 }
  0xa1   : > { %v576_v2 = vpop.permute.xlu0 %575  ;;  %v467_v21 = vadd.f32 %v459_v12, %v417_v10  ;;  %v468_v23 = vadd.f32 %v460_v13, %v418_v11 }
  0xa2   : > { %v1196_v3 = vadd.f32 %v576_v2, %v561_v0  ;;  %v1198_v4 = vadd.f32 %v576_v2, %v562_v1 }
  0xa3   : > { %v525_v5 = vpop.permute.xlu1 %524  ;;  %v517_v41 = vadd.f32 %v509_v19, %v467_v21  ;;  %v518_v44 = vadd.f32 %v510_v20, %v468_v23  ;;  %v711_v19 = vld [vmem:[#allocation2 + $0x8] sm:$0xff] }
  0xa4   : > { %v601_v6 = vmax.f32 %v1196_v3, 0.0  ;;  %v602_v7 = vmax.f32 %v1198_v4, 0.0  ;;  %v555_v34 = vmul.f32 %v548_v50, %v525_v5  ;;  %v556_v35 = vmul.f32 %v552_v51, %v525_v5  ;;  %v610_v3 = vld [vmem:[%s1252_s4] sm:$0x3] }
  0xa5   : > { %v591_v32 = vpop.permute.xlu0 %590 }
  0xa6   : > { %v724_v8 = vadd.f32 %v602_v7, %v601_v6  ;;  %v563_v38 = vadd.f32 %v555_v34, %v513_v33  ;;  %v564_v39 = vadd.f32 %v556_v35, %v514_v49 }
  0xa8   : > { %v479_v9 = vpop.permute.xlu1 %478  ;;  %725 = vadd.xlane.f32.xlu1 %v724_v8 }
  0xa9   : > { %v507_v47 = vmul.f32 %v498_v42, %v479_v9  ;;  %v508_v48 = vmul.f32 %v502_v43, %v479_v9 }
  0xab   : > { %v515_v58 = vadd.f32 %v507_v47, %v465_v52  ;;  %v516_v59 = vadd.f32 %v508_v48, %v466_v53 }
  0xad   : > { %v529_v18 = vpop.permute.xlu1 %528 }
  0xae   : > { %v557_v36 = vmul.f32 %v548_v50, %v529_v18  ;;  %v558_v37 = vmul.f32 %v552_v51, %v529_v18  ;;  %v713_v18 = vld [vmem:[#allocation2 + $0x18] sm:$0xff] }
  0xb0   : > { %v565_v63 = vadd.f32 %v557_v36, %v515_v58  ;;  %v566_v0 = vadd.f32 %v558_v37, %v516_v59  ;;  %v759_v37 = vld [vmem:[%s1254_s6 + $0x8] sm:$0x3] }
  0xb1   : > { %v533_v40 = vpop.permute.xlu1 %532 }
  0xb2   : > { %v559_v46 = vmul.f32 %v548_v50, %v533_v40  ;;  %v560_v22 = vmul.f32 %v552_v51, %v533_v40 }
  0xb4   : > { %v567_v54 = vadd.f32 %v559_v46, %v517_v41  ;;  %v568_v55 = vadd.f32 %v560_v22, %v518_v44  ;;  %v757_v22 = vld [vmem:[%s1253_s5 + $0x8] sm:$0x3] }
  0xb6   : > { %v581_v45 = vpop.permute.xlu1 %580  ;;  %v599_v56 = vadd.f32 %v591_v32, %v567_v54  ;;  %v600_v57 = vadd.f32 %v591_v32, %v568_v55  ;;  %v758_v54 = vld [vmem:[%s1254_s6] sm:$0xff] }
  0xb7   : > { %v595_v60 = vadd.f32 %v581_v45, %v563_v38  ;;  %v596_v61 = vadd.f32 %v581_v45, %v564_v39 }
  0xb8   : > { %v607_v42 = vmax.f32 %v599_v56, 0.0  ;;  %v608_v43 = vmax.f32 %v600_v57, 0.0 }
  0xb9   : > { %v603_v62 = vmax.f32 %v595_v60, 0.0  ;;  %v604_v1 = vmax.f32 %v596_v61, 0.0 }
  0xba   : > { %v586_v2 = vpop.permute.xlu1 %585  ;;  %v733_v4 = vadd.f32 %v608_v43, %v607_v42 }
  0xbb   : > { %v597_v5 = vadd.f32 %v586_v2, %v565_v63  ;;  %v598_v50 = vadd.f32 %v586_v2, %v566_v0  ;;  %v1010_v51 = vpack.c.bf16 %v604_v1, %v602_v7  ;;  %v727_v8 = vadd.f32 %v604_v1, %v603_v62  ;;  %v609_v7 = vld [vmem:[%s1251_s3] sm:$0x3] }
  0xbc   : > { %734 = vadd.xlane.f32.xlu1 %v733_v4  ;;  %v1012_v9 = vpack.c.bf16 %v603_v62, %v601_v6  ;;  %v756_v6 = vld [vmem:[%s1253_s5] sm:$0xff] }
  0xbd   : > { %v605_v10 = vmax.f32 %v597_v5, 0.0  ;;  %v606_v11 = vmax.f32 %v598_v50, 0.0  ;;  %1011 = vmatprep.subr.bf16.mxu0 %v1010_v51  ;;  %728 = vadd.xlane.f32.xlu0 %v727_v8 }
  0xbe   : > { %1013 = vmatpush1.bf16.msra.mxu0 %v1012_v9  ;;  %1007 = vmatprep.mubr.msk.f32.mxu1 %vm616_vm1, %v756_v6 }
  0xbf   : > { %v730_v12 = vadd.f32 %v606_v11, %v605_v10  ;;  %v1014_v13 = vpack.c.bf16 %v608_v43, %v606_v11  ;;  %v1016_v14 = vpack.c.bf16 %v607_v42, %v605_v10 }
  0xc1   : > { %731 = vadd.xlane.f32.xlu0 %v730_v12  ;;  %1015 = vmatprep.subr.bf16.mxu0 %v1014_v13 }
  0xc2   : > { %1017 = vmatpush1.bf16.msra.mxu0 %v1016_v14 }
  0xc5   : > { %984 = vmatmul.mubr.msk.f32.vlgmr.msra.gmra.mrb[0].mxu0 %vm616_vm1, %v609_v7 }
  0xd7   : > { %613 = vperm.xlu0 %1063, %v610_v3  }
 0x135   : > { %v726_v16 = vpop.xlane.xlu1 %725 }
 0x136   : > { %v736_v17 = vadd.f32 %v726_v16, %v710_v15 }
 0x138   : > { %741 = vst.msk [vmem:[#allocation2] sm:$0xff] %vm362_vm0, %v736_v17 }
 0x13f   : > { %v748_v28 = vld [vmem:[#allocation2] sm:$0xff] }
 0x140   : > { %v752_v30 = vmul.f32 0.00390625, %v748_v28 }
 0x149   : > { %v735_v20 = vpop.xlane.xlu1 %734 }
 0x14a   : > { %v739_v21 = vadd.f32 %v735_v20, %v713_v18  ;;  %v729_v23 = vpop.xlane.xlu0 %728 }
 0x14b   : > { %v737_v24 = vadd.f32 %v729_v23, %v711_v19 }
 0x14c   : > { %744 = vst.msk [vmem:[#allocation2 + $0x18] sm:$0xff] %vm362_vm0, %v739_v21 }
 0x14d   : > { %742 = vst.msk [vmem:[#allocation2 + $0x8] sm:$0xff] %vm362_vm0, %v737_v24 }
 0x14e   : > { %v732_v26 = vpop.xlane.xlu0 %731 }
 0x14f   : > { %v738_v27 = vadd.f32 %v732_v26, %v712_v25 }
 0x151   : > { %743 = vst.msk [vmem:[#allocation2 + $0x10] sm:$0xff] %vm362_vm0, %v738_v27 }
 0x153   : > { %v751_v34 = vld [vmem:[#allocation2 + $0x18] sm:$0xff] }
 0x154   : > { %v749_v29 = vld [vmem:[#allocation2 + $0x8] sm:$0xff]  ;;  %v755_v44 = vmul.f32 0.00390625, %v751_v34 }
 0x155   : > { %v753_v31 = vmul.f32 0.00390625, %v749_v29 }
 0x156   : > { %v614_v47 = vpop.permute.xlu0 %613 }
 0x157   : > { %v1018_v35 = vpack.c.bf16 %v753_v31, %v752_v30 }
 0x158   : > { %v750_v40 = vld [vmem:[#allocation2 + $0x10] sm:$0xff] }
 0x159   : > { %1019 = vmatprep.subr.bf16.mxu1 %v1018_v35  ;;  %v754_v41 = vmul.f32 0.00390625, %v750_v40 }
 0x15a   : > { %1021 = vmatpush3.bf16.msra.mxu1 %v1018_v35 }
 0x15b   : > { %v1022_v46 = vpack.c.bf16 %v755_v44, %v754_v41 }
 0x15d   : > { %1023 = vmatprep.subr.bf16.mxu1 %v1022_v46 }
 0x15e   : > { %1025 = vmatpush3.bf16.msra.mxu1 %v1022_v46 }
 0x161   : > { %1008 = vmatmul.mubr.msk.f32.vlgmr.msra.gmra.mrb[0].mxu1 %vm616_vm1, %v757_v22 }
 0x198   : > { %v686_v48 = vpop.f32.mrb[0].mxu0 }
 0x199   : > { %v687_v33 = vadd.f32 %v686_v48, %v614_v47  ;;  %v688_v49 = vpop.f32.mrb[1].mxu0 }
 0x19a   : > { %v689_v52 = vadd.f32 %v688_v49, %v614_v47 }
 0x19c   : > { %v693_v53 = vcombine.low %v687_v33, %v689_v52 }
 0x19e   : > { %985 = vst.sshfl [vmem:[%s351_s22] sm:$0x33 pattern:$0x76325410] %v693_v53 }
 0x234   : > { %v1009_v55 = vpop.f32.mrb[0].mxu1 }
 0x235   : > { %v832_v32 = vpop.f32.mrb[1].mxu1  ;;  %v838_v38 = vadd.f32 %v1009_v55, %v759_v37 }
 0x236   : > { %v833_v36 = vadd.f32 %v832_v32, %v758_v54 }
 0x238   : > { %843 = vperm.xlu1 %1065, %v833_v36  }
 0x23c   : > { %848 = vperm.xlu1 %1065, %v838_v38  }
 0x2b7   : > { %v844_v39 = vpop.permute.xlu1 %843 }
 0x2b8   : > { %851 = vst [vmem:[%s357_s12] sm:$0xff] %v844_v39 }
 0x2bb   : > { %v849_v45 = vpop.permute.xlu1 %848 }
 0x2bc   : > { %852 = vst [vmem:[%s357_s12 + $0x8] sm:$0x3] %v849_v45 }
 0x2bd PF: > { %s19_s29 = sadd.s32 1, %s1088_s29   ;;  %s1257_s27 = smov %s1084_s28 }
 0x2be   : > { %p16_p5 = scmp.ge.s32.totalorder %s19_s29, 4   ;;  %s1258_s28 = smov %s1260_s30 }
 0x2c0   :  { %18 = sbr.rel (!%p16_p5) target bundleno = 2 (0x2), region = 98 }

</bundles_post_ra>
